<compile_context>
chip_gen: v7x
topology: tpu7x:2x2x1
jax: 0.10.0
libtpu: 0.0.40
codegen_flags: <defaults>
</compile_context>

<pallas_src>
import functools
import math

import jax
import jax.numpy as jnp
from jax.experimental import pallas as pl
from jax.experimental.pallas import tpu as pltpu


# --------------------------------------------------------------------------
# Stage 1: instance classifier + running per-class (max, index) over instances.
# --------------------------------------------------------------------------
def _stage1_kernel(x_ref, wi_t_ref, bi_ref,
                   classes_t_ref, rmax_ref, ridx_ref,
                   *, n_rows, tile_n, tiles_per_core, ragged):
    c = pl.program_id(0)          # core slice
    t = pl.program_id(1)          # tile within the core slice
    start = (c * tiles_per_core + t) * tile_n   # unclamped global column offset

    @pl.when(t == 0)
    def _init():
        rmax_ref[...] = jnp.full(rmax_ref.shape, -jnp.inf, rmax_ref.dtype)
        ridx_ref[...] = jnp.zeros(ridx_ref.shape, ridx_ref.dtype)

    x = x_ref[...]                                                    # (TN, K)

    # classes in lane-dense transposed layout: (C, TN) = Wi^T @ x^T  (MXU, f32 acc)
    cls_t = jax.lax.dot_general(
        wi_t_ref[...], x, (((1,), (1,)), ((), ())),
        preferred_element_type=jnp.float32) + bi_ref[...]             # (C, TN)
    classes_t_ref[...] = cls_t

    # Column mask only (cheap (C, TN) select); OOB rows only ever land in columns
    # >= n_rows, which are excluded here and sliced away in the wrapper.
    col = jax.lax.broadcasted_iota(jnp.int32, cls_t.shape, 1) + start
    cls_red = jnp.where(col < n_rows, cls_t, -jnp.inf) if ragged else cls_t

    # per-class running argmax over instances (first index on ties, like argmax)
    tile_max = jnp.max(cls_red, axis=1, keepdims=True)                # (C, 1)
    big = jnp.int32(jnp.iinfo(jnp.int32).max)
    tile_idx = jnp.min(jnp.where(cls_red >= tile_max, col, big),
                       axis=1, keepdims=True)                         # (C, 1) int32

    better = tile_max > rmax_ref[0]                                   # strict > keeps first
    rmax_ref[0] = jnp.where(better, tile_max, rmax_ref[0])
    ridx_ref[0] = jnp.where(better, tile_idx, ridx_ref[0])


# --------------------------------------------------------------------------
# Stage 2: attention logits + flash-style online softmax + bag-embedding partials.
# --------------------------------------------------------------------------
def _stage2_kernel(x_ref, wq1_ref, bq1_ref, wq2_ref, bq2_ref, qmax_ref,
                   logits_t_ref, m_ref, l_ref, bacc_ref,
                   *, n_rows, tile_n, tiles_per_core, ragged, scale):
    c = pl.program_id(0)
    t = pl.program_id(1)
    start = (c * tiles_per_core + t) * tile_n

    @pl.when(t == 0)
    def _init():
        m_ref[...] = jnp.full(m_ref.shape, -jnp.inf, m_ref.dtype)
        l_ref[...] = jnp.zeros(l_ref.shape, l_ref.dtype)
        bacc_ref[...] = jnp.zeros(bacc_ref.shape, bacc_ref.dtype)

    x = x_ref[...]                                                    # (TN, K)
    if ragged:
        # x feeds the e @ x accumulation dot, so OOB rows (undefined data in the
        # boundary block / clamped dummy blocks) must be zeroed here.
        rows = jax.lax.broadcasted_iota(jnp.int32, (x.shape[0], 1), 0) + start
        x = jnp.where(rows < n_rows, x, jnp.zeros_like(x))

    # q(feats) for this tile (matmul operands in x's dtype, f32 accumulation)
    h1 = jnp.maximum(
        jnp.dot(x, wq1_ref[...], preferred_element_type=jnp.float32)
        + bq1_ref[...], 0.0)                                          # (TN, Qh)
    q = jnp.tanh(
        jnp.dot(h1.astype(x.dtype), wq2_ref[...],
                preferred_element_type=jnp.float32) + bq2_ref[...])   # (TN, Qh) f32

    # attention logits in lane-dense layout: (C, TN) = q_max @ q^T, * 1/sqrt(Qh)
    logits_t = jax.lax.dot_general(
        qmax_ref[...], q, (((1,), (1,)), ((), ())),
        preferred_element_type=jnp.float32) * scale                   # (C, TN)
    logits_t_ref[...] = logits_t

    col = jax.lax.broadcasted_iota(jnp.int32, logits_t.shape, 1) + start
    logits_red = (jnp.where(col < n_rows, logits_t, -jnp.inf)
                  if ragged else logits_t)

    # online softmax over instances (lanes) + bag-embedding accumulation
    m_prev = m_ref[0]                                                 # (C, 1)
    m_new = jnp.maximum(m_prev, jnp.max(logits_red, axis=1, keepdims=True))
    alpha = jnp.exp(m_prev - m_new)                                   # (C, 1)
    e = jnp.exp(logits_red - m_new)                                   # (C, TN)
    l_ref[0] = alpha * l_ref[0] + jnp.sum(e, axis=1, keepdims=True)
    bacc_ref[0] = alpha * bacc_ref[0] + jnp.dot(
        e.astype(x.dtype), x, preferred_element_type=jnp.float32)     # (C, K)
    m_ref[0] = m_new


# --------------------------------------------------------------------------
# Wrapper.
# --------------------------------------------------------------------------
def dsmil_forward(x, params, *, tile_n=None, block_bytes=8 * 1024 * 1024,
                  split_cores=True, vmem_limit_bytes=48 * 1024 * 1024):
    x = jnp.asarray(x)
    N, K = x.shape
    C = params["wi"].shape[1]
    Qh = params["wq1"].shape[1]
    f32 = jnp.float32
    cd = x.dtype                            # matmul operand dtype = feature dtype
    esize = jnp.dtype(cd).itemsize

    # ---- instance tiling: ~block_bytes of x per block, minimal trailing padding ----
    if tile_n is None:
        cap = block_bytes // max(1, K * esize)
        cap = max(256, min(8192, (cap // 128) * 128))
        if N <= cap:
            tile_n = N                                       # whole bag in one block
        else:
            k = -(-N // (2 * cap))                           # tile-pairs per core
            tile_n = ((-(-N // (2 * k)) + 127) // 128) * 128
    tile_n = int(min(tile_n, N))
    assert tile_n == N or tile_n % 128 == 0, "tile_n must be a multiple of 128"

    tiles_total = -(-N // tile_n)
    num_cores = 2 if (split_cores and tiles_total >= 2) else 1
    tiles_per_core = -(-tiles_total // num_cores)
    n_out = num_cores * tiles_per_core * tile_n              # padded output width
    ragged = (n_out != N)

    # ---- small parameters (matmul operands cast to x's dtype; biases stay f32) ----
    wi_t = jnp.transpose(params["wi"]).astype(cd)            # (C, K)
    bi = jnp.reshape(params["bi"], (C, 1)).astype(f32)       # (C, 1)
    wq1 = params["wq1"].astype(cd)                           # (K, Qh)
    bq1 = jnp.reshape(params["bq1"], (1, Qh)).astype(f32)
    wq2 = params["wq2"].astype(cd)                           # (Qh, Qh)
    bq2 = jnp.reshape(params["bq2"], (1, Qh)).astype(f32)

    cparams = pltpu.CompilerParams(
        dimension_semantics=("parallel", "arbitrary"),       # cores x instance tiles
        vmem_limit_bytes=vmem_limit_bytes)

    def x_idx(c, t):
        # Clamp to the last real block: dummy steps (odd tile counts) re-read it;
        # their columns are all >= N so the masks neutralize them.
        return (jnp.minimum(c * tiles_per_core + t, tiles_total - 1), 0)

    x_spec = pl.BlockSpec((tile_n, K), x_idx)
    lane_spec = pl.BlockSpec((C, tile_n),
                             lambda c, t: (0, c * tiles_per_core + t))  # lane-dense (C, N)

    def _const(shape):
        rank = len(shape)
        return pl.BlockSpec(shape, lambda c, t, _r=rank: (0,) * _r)

    def _percore(shape):
        return pl.BlockSpec((1,) + shape,
                            lambda c, t, _r=len(shape): (c,) + (0,) * _r)

    # ---- stage 1: classes + per-core running (max, index) partials ----
    classes_t, rmax_p, ridx_p = pl.pallas_call(
        functools.partial(_stage1_kernel, n_rows=N, tile_n=tile_n,
                          tiles_per_core=tiles_per_core, ragged=ragged),
        grid=(num_cores, tiles_per_core),
        in_specs=[x_spec, _const((C, K)), _const((C, 1))],
        out_specs=(lane_spec, _percore((C, 1)), _percore((C, 1))),
        out_shape=(jax.ShapeDtypeStruct((C, n_out), f32),
                   jax.ShapeDtypeStruct((num_cores, C, 1), f32),
                   jax.ShapeDtypeStruct((num_cores, C, 1), jnp.int32)),
        compiler_params=cparams,
    )(x, wi_t, bi)

    # merge per-core argmax partials (argmax ties -> core 0 -> lower instance index)
    best_core = jnp.argmax(rmax_p[..., 0], axis=0)                        # (C,)
    idx = jnp.take_along_axis(ridx_p[..., 0], best_core[None, :], axis=0)[0]  # (C,)

    # critical-instance features + q(m_feats): tiny (C, K) work, plain XLA
    m_feats = x[idx]                                                      # (C, K)
    h1m = jnp.maximum(
        jnp.dot(m_feats, wq1, preferred_element_type=f32) + bq1, 0.0)
    q_max = jnp.tanh(
        jnp.dot(h1m.astype(cd), wq2, preferred_element_type=f32) + bq2)   # (C, Qh) f32

    # ---- stage 2: attention logits + per-core online-softmax / bag partials ----
    scale = 1.0 / math.sqrt(Qh)                                           # compile-time
    logits_t, m_p, l_p, bacc_p = pl.pallas_call(
        functools.partial(_stage2_kernel, n_rows=N, tile_n=tile_n,
                          tiles_per_core=tiles_per_core, ragged=ragged, scale=scale),
        grid=(num_cores, tiles_per_core),
        in_specs=[x_spec, _const((K, Qh)), _const((1, Qh)), _const((Qh, Qh)),
                  _const((1, Qh)), _const((C, Qh))],
        out_specs=(lane_spec, _percore((C, 1)), _percore((C, 1)), _percore((C, K))),
        out_shape=(jax.ShapeDtypeStruct((C, n_out), f32),  # logits (lane-dense)
                   jax.ShapeDtypeStruct((num_cores, C, 1), f32),   # softmax max
                   jax.ShapeDtypeStruct((num_cores, C, 1), f32),   # softmax denom
                   jax.ShapeDtypeStruct((num_cores, C, K), f32)),  # bag partial
        compiler_params=cparams,
    )(x, wq1, bq1, wq2, bq2, q_max)

    # ---- merge partials + normalize (tiny arrays; exact divides, fused by XLA) ----
    m_all = jnp.max(m_p, axis=0)                           # (C, 1)
    w = jnp.exp(m_p - m_all)                               # (num_cores, C, 1)
    l_all = jnp.sum(w * l_p, axis=0)                       # (C, 1)
    B = jnp.sum(w * bacc_p, axis=0) / l_all                # (C, K)
    A = (jnp.exp(logits_t[:, :N] - m_all) / l_all).T       # (N, C)  exp/div/transpose fused
    classes = classes_t[:, :N].T                           # (N, C)

    # fcc = Conv1d(C, C, kernel=K) on B[None]: one contraction over (C_in, K)
    pred = (jnp.einsum("oik,ik->o", params["wfcc"].astype(f32), B)
            + jnp.reshape(params["bfcc"], (-1,)).astype(f32))[None, :]   # (1, C)

    return classes, pred, A, B[None]


# --------------------------------------------------------------------------
# Pure-JAX reference mirroring the PyTorch semantics.
# --------------------------------------------------------------------------
def dsmil_reference(x, p):
    Qh = p["wq1"].shape[1]
    feats = x
    classes = x @ p["wi"] + p["bi"]
    q = lambda h: jnp.tanh(jnp.maximum(h @ p["wq1"] + p["bq1"], 0.0)
                           @ p["wq2"] + p["bq2"])
    Q = q(feats)
    idx = jnp.argmax(classes, axis=0)                  # m_indices[0, :]
    m_feats = feats[idx]                               # (C, K)
    q_max = q(m_feats)
    A = jax.nn.softmax((Q @ q_max.T) / jnp.sqrt(jnp.float32(Qh)), axis=0)
    B = A.T @ feats                                    # (C, K)
    pred = jnp.einsum("oik,ik->o", p["wfcc"], B) + p["bfcc"][0]
    return classes, pred[None, :], A, B[None]


def init_params(key, K, C, Qh):
    ks = jax.random.split(key, 5)
    s = 0.1
    return {
        "wi":   (jax.random.normal(ks[0], (K, C)) * s).astype(jnp.float32),
        "bi":   jnp.zeros((1, C), jnp.float32),
        "wq1":  (jax.random.normal(ks[1], (K, Qh)) * s).astype(jnp.float32),
        "bq1":  jnp.full((1, Qh), 0.01, jnp.float32),
        "wq2":  (jax.random.normal(ks[2], (Qh, Qh)) * s).astype(jnp.float32),
        "bq2":  jnp.full((1, Qh), -0.01, jnp.float32),
        "wfcc": (jax.random.normal(ks[3], (C, C, K)) * s).astype(jnp.float32),
        "bfcc": (jax.random.normal(ks[4], (1, C)) * s).astype(jnp.float32),
    }


def _run_case(name, key, *, N, K, C, Qh, tile_n, in_dtype, atol, rtol):
    kx, kp = jax.random.split(key)
    x32 = jax.random.normal(kx, (N, K), dtype=jnp.float32)
    params = init_params(kp, K, C, Qh)
    x_in = x32.astype(in_dtype)

    outs = jax.block_until_ready(dsmil_forward(x_in, params, tile_n=tile_n))

    # reference is fed the same rounded matmul operands (exact for f32)
    rd = lambda a: a.astype(in_dtype).astype(jnp.float32)
    ref_x = rd(x32)
    ref_p = {k: (rd(v) if k in ("wi", "wq1", "wq2") else v)
             for k, v in params.items()}
    refs = dsmil_reference(ref_x, ref_p)

    for out_name, o, r in zip(("classes", "prediction_bag", "A", "B"), outs, refs):
        assert o.shape == r.shape, (name, out_name, o.shape, r.shape)
        o32 = o.astype(jnp.float32)
        err = float(jnp.max(jnp.abs(o32 - r)))
        assert bool(jnp.allclose(o32, r, atol=atol, rtol=rtol)), (name, out_name, err)


if __name__ == "__main__":
    key = jax.random.PRNGKey(0)
    k1, k2, k3, k4 = jax.random.split(key, 4)

    # tiny single-tile bag (whole bag in one block, no core split)
    _run_case("tiny_f32", k1, N=8, K=32, C=4, Qh=16, tile_n=None,
              in_dtype=jnp.float32, atol=1e-4, rtol=2e-2)
    # multi-tile bag split across the two-core "parallel" axis, evenly divisible
    _run_case("split_f32", k2, N=512, K=128, C=4, Qh=64, tile_n=128,
              in_dtype=jnp.float32, atol=1e-4, rtol=2e-2)
    # ragged bag: odd tile count -> clamped dummy step + partially-OOB boundary block
    _run_case("ragged_f32", k3, N=600, K=128, C=4, Qh=64, tile_n=128,
              in_dtype=jnp.float32, atol=1e-4, rtol=2e-2)
    # bf16 features from the producer (no wrapper-side cast pass), f32 accumulation
    _run_case("split_bf16", k4, N=512, K=128, C=4, Qh=64, tile_n=128,
              in_dtype=jnp.bfloat16, atol=5e-2, rtol=6e-2)

    print("KERNEL_OK")
</pallas_src>

<mosaic_0001>
module attributes {stable_mosaic.version = 11 : i64} {
  func.func @_stage1_kernel(%arg0: i32, %arg1: i32, %arg2: memref<8x32xf32, #tpu.memory_space<vmem>>, %arg3: memref<4x32xf32, #tpu.memory_space<vmem>>, %arg4: memref<4x1xf32, #tpu.memory_space<vmem>>, %arg5: memref<4x8xf32, #tpu.memory_space<vmem>>, %arg6: memref<1x4x1xf32, #tpu.memory_space<vmem>>, %arg7: memref<1x4x1xi32, #tpu.memory_space<vmem>>) attributes {dimension_semantics = [#tpu.dimension_semantics<parallel>, #tpu.dimension_semantics<arbitrary>], iteration_bounds = array<i64: 1, 1>, scalar_prefetch = 0 : i64, scratch_operands = 0 : i64, tpu.core_type = #tpu.core_type<tc>, window_params = [{transform_indices = @transform_0, window_bounds = array<i64: 8, 32>}, {pipeline_mode = #tpu.pipeline_mode<synchronous>, transform_indices = @transform_1, window_bounds = array<i64: 4, 32>}, {pipeline_mode = #tpu.pipeline_mode<synchronous>, transform_indices = @transform_2, window_bounds = array<i64: 4, 1>}, {transform_indices = @transform_3, window_bounds = array<i64: 4, 8>}, {transform_indices = @transform_4, window_bounds = array<i64: 1, 4, 1>}, {transform_indices = @transform_5, window_bounds = array<i64: 1, 4, 1>}]} {
    %c1_i32 = arith.constant 1 : i32
    %0 = arith.muli %arg0, %c1_i32 : i32
    %1 = arith.addi %0, %arg1 : i32
    %c8_i32 = arith.constant 8 : i32
    %2 = arith.muli %1, %c8_i32 : i32
    %c0_i32 = arith.constant 0 : i32
    %3 = arith.cmpi eq, %arg1, %c0_i32 : i32
    %4 = arith.extui %3 : i1 to i32
    %c0_i32_0 = arith.constant 0 : i32
    %5 = arith.cmpi ne, %4, %c0_i32_0 : i32
    scf.if %5 {
      %cst_25 = arith.constant 0xFF800000 : f32
      %39 = vector.broadcast %cst_25 : f32 to vector<1x4x1xf32>
      %c0_26 = arith.constant 0 : index
      %c0_27 = arith.constant 0 : index
      %c0_28 = arith.constant 0 : index
      %40 = vector.load %arg6[%c0_26, %c0_27, %c0_28] : memref<1x4x1xf32, #tpu.memory_space<vmem>>, vector<1x4x1xf32>
      tpu.vector_store %arg6[%c0_26, %c0_27, %c0_28], %39 {strides = array<i32>} : memref<1x4x1xf32, #tpu.memory_space<vmem>>, vector<1x4x1xf32>,
      %c0_i32_29 = arith.constant 0 : i32
      %41 = vector.broadcast %c0_i32_29 : i32 to vector<1x4x1xi32>
      %c0_30 = arith.constant 0 : index
      %c0_31 = arith.constant 0 : index
      %c0_32 = arith.constant 0 : index
      %42 = vector.load %arg7[%c0_30, %c0_31, %c0_32] : memref<1x4x1xi32, #tpu.memory_space<vmem>>, vector<1x4x1xi32>
      tpu.vector_store %arg7[%c0_30, %c0_31, %c0_32], %41 {strides = array<i32>} : memref<1x4x1xi32, #tpu.memory_space<vmem>>, vector<1x4x1xi32>,
    } else {
    }
    %c0 = arith.constant 0 : index
    %c0_1 = arith.constant 0 : index
    %6 = vector.load %arg2[%c0, %c0_1] : memref<8x32xf32, #tpu.memory_space<vmem>>, vector<8x32xf32>
    %c0_2 = arith.constant 0 : index
    %c0_3 = arith.constant 0 : index
    %7 = vector.load %arg3[%c0_2, %c0_3] : memref<4x32xf32, #tpu.memory_space<vmem>>, vector<4x32xf32>
    %cst = arith.constant dense<0.000000e+00> : vector<4x8xf32>
    %8 = tpu.matmul %7, %6, %cst {dimension_numbers = #tpu.dot_dimension_numbers<[1], [1], [0], [0], [0, 0, 1, 0], [], []>} : vector<4x32xf32>, vector<8x32xf32>, vector<4x8xf32> -> vector<4x8xf32>
    %c0_4 = arith.constant 0 : index
    %c0_5 = arith.constant 0 : index
    %9 = vector.load %arg4[%c0_4, %c0_5] : memref<4x1xf32, #tpu.memory_space<vmem>>, vector<4x1xf32>
    %10 = vector.broadcast %9 : vector<4x1xf32> to vector<4x8xf32>
    %11 = arith.addf %8, %10 : vector<4x8xf32>
    %c0_6 = arith.constant 0 : index
    %c0_7 = arith.constant 0 : index
    %12 = vector.load %arg5[%c0_6, %c0_7] : memref<4x8xf32, #tpu.memory_space<vmem>>, vector<4x8xf32>
    tpu.vector_store %arg5[%c0_6, %c0_7], %11 {strides = array<i32>} : memref<4x8xf32, #tpu.memory_space<vmem>>, vector<4x8xf32>,
    %13 = tpu.iota {dimensions = array<i32: 1>} : vector<4x8xi32>
    %14 = vector.broadcast %2 : i32 to vector<4x8xi32>
    %15 = arith.addi %13, %14 : vector<4x8xi32>
    %cst_8 = arith.constant dense<0xFF800000> : vector<4xf32>
    %16 = vector.multi_reduction <maximumf>, %11, %cst_8 [1] : vector<4x8xf32> to vector<4xf32>
    %17 = vector.shape_cast %16 : vector<4xf32> to vector<4x1xf32>
    %18 = vector.broadcast %17 : vector<4x1xf32> to vector<4x8xf32>
    %19 = arith.cmpf oge, %11, %18 : vector<4x8xf32>
    %c2147483647_i32 = arith.constant 2147483647 : i32
    %20 = vector.broadcast %c2147483647_i32 : i32 to vector<4x8xi32>
    %21 = arith.select %19, %15, %20 : vector<4x8xi1>, vector<4x8xi32>
    %cst_9 = arith.constant dense<2147483647> : vector<4xi32>
    %22 = vector.multi_reduction <minsi>, %21, %cst_9 [1] : vector<4x8xi32> to vector<4xi32>
    %23 = vector.shape_cast %22 : vector<4xi32> to vector<4x1xi32>
    %c0_10 = arith.constant 0 : index
    %c0_11 = arith.constant 0 : index
    %c0_12 = arith.constant 0 : index
    %24 = vector.load %arg6[%c0_10, %c0_11, %c0_12] : memref<1x4x1xf32, #tpu.memory_space<vmem>>, vector<1x4x1xf32>
    %25 = vector.shape_cast %24 : vector<1x4x1xf32> to vector<4x1xf32>
    %26 = arith.cmpf ogt, %17, %25 : vector<4x1xf32>
    %c0_13 = arith.constant 0 : index
    %c0_14 = arith.constant 0 : index
    %c0_15 = arith.constant 0 : index
    %27 = vector.load %arg6[%c0_13, %c0_14, %c0_15] : memref<1x4x1xf32, #tpu.memory_space<vmem>>, vector<1x4x1xf32>
    %28 = vector.shape_cast %27 : vector<1x4x1xf32> to vector<4x1xf32>
    %29 = arith.select %26, %17, %28 : vector<4x1xi1>, vector<4x1xf32>
    %c0_16 = arith.constant 0 : index
    %c0_17 = arith.constant 0 : index
    %c0_18 = arith.constant 0 : index
    %30 = vector.load %arg6[%c0_16, %c0_17, %c0_18] : memref<1x4x1xf32, #tpu.memory_space<vmem>>, vector<1x4x1xf32>
    %31 = vector.shape_cast %30 : vector<1x4x1xf32> to vector<4x1xf32>
    %32 = vector.shape_cast %29 : vector<4x1xf32> to vector<1x4x1xf32>
    tpu.vector_store %arg6[%c0_16, %c0_17, %c0_18], %32 {strides = array<i32>} : memref<1x4x1xf32, #tpu.memory_space<vmem>>, vector<1x4x1xf32>,
    %c0_19 = arith.constant 0 : index
    %c0_20 = arith.constant 0 : index
    %c0_21 = arith.constant 0 : index
    %33 = vector.load %arg7[%c0_19, %c0_20, %c0_21] : memref<1x4x1xi32, #tpu.memory_space<vmem>>, vector<1x4x1xi32>
    %34 = vector.shape_cast %33 : vector<1x4x1xi32> to vector<4x1xi32>
    %35 = arith.select %26, %23, %34 : vector<4x1xi1>, vector<4x1xi32>
    %c0_22 = arith.constant 0 : index
    %c0_23 = arith.constant 0 : index
    %c0_24 = arith.constant 0 : index
    %36 = vector.load %arg7[%c0_22, %c0_23, %c0_24] : memref<1x4x1xi32, #tpu.memory_space<vmem>>, vector<1x4x1xi32>
    %37 = vector.shape_cast %36 : vector<1x4x1xi32> to vector<4x1xi32>
    %38 = vector.shape_cast %35 : vector<4x1xi32> to vector<1x4x1xi32>
    tpu.vector_store %arg7[%c0_22, %c0_23, %c0_24], %38 {strides = array<i32>} : memref<1x4x1xi32, #tpu.memory_space<vmem>>, vector<1x4x1xi32>,
    return
  }
  func.func @transform_0(%arg0: i32, %arg1: i32) -> (i32, i32) {
    %c1_i32 = arith.constant 1 : i32
    %0 = arith.muli %arg0, %c1_i32 : i32
    %1 = arith.addi %0, %arg1 : i32
    %c0_i32 = arith.constant 0 : i32
    %2 = arith.minsi %1, %c0_i32 : i32
    %c0_i32_0 = arith.constant 0 : i32
    %c0_i32_1 = arith.constant 0 : i32
    return %2, %c0_i32_0 : i32, i32
  }
  func.func @transform_1(%arg0: i32, %arg1: i32) -> (i32, i32) {
    %c0_i32 = arith.constant 0 : i32
    %c0_i32_0 = arith.constant 0 : i32
    %c0_i32_1 = arith.constant 0 : i32
    return %c0_i32, %c0_i32_0 : i32, i32
  }
  func.func @transform_2(%arg0: i32, %arg1: i32) -> (i32, i32) {
    %c0_i32 = arith.constant 0 : i32
    %c0_i32_0 = arith.constant 0 : i32
    %c0_i32_1 = arith.constant 0 : i32
    return %c0_i32, %c0_i32_0 : i32, i32
  }
  func.func @transform_3(%arg0: i32, %arg1: i32) -> (i32, i32) {
    %c1_i32 = arith.constant 1 : i32
    %0 = arith.muli %arg0, %c1_i32 : i32
    %1 = arith.addi %0, %arg1 : i32
    %c0_i32 = arith.constant 0 : i32
    %c0_i32_0 = arith.constant 0 : i32
    return %c0_i32, %1 : i32, i32
  }
  func.func @transform_4(%arg0: i32, %arg1: i32) -> (i32, i32, i32) {
    %c0_i32 = arith.constant 0 : i32
    %c0_i32_0 = arith.constant 0 : i32
    %c0_i32_1 = arith.constant 0 : i32
    return %arg0, %c0_i32, %c0_i32_0 : i32, i32, i32
  }
  func.func @transform_5(%arg0: i32, %arg1: i32) -> (i32, i32, i32) {
    %c0_i32 = arith.constant 0 : i32
    %c0_i32_0 = arith.constant 0 : i32
    %c0_i32_1 = arith.constant 0 : i32
    return %arg0, %c0_i32, %c0_i32_0 : i32, i32, i32
  }
}

</mosaic_0001>

<bundles_post_ra>
// kernel: tpu_custom_call.1
= control target key start
LH: loop header
LB: loop body
LE: loop exit
PB: predicated region body
PF: predicated region fallthrough
CT: control target
= control target key end

     0   :  { %11 = vsyncpa [#allocation3], 0  ;;  %s349_s0 = inlined_call_operand.hbm [shape: f32[8,32], index: 0, kind: input, shape index: {}]   ;;  %s350_s1 = inlined_call_operand.vmem [shape: f32[4,32], index: 1, kind: input, shape index: {}]   ;;  %s351_s2 = inlined_call_operand.vmem [shape: f32[4,1], index: 2, kind: input, shape index: {}]   ;;  %s352_s3 = inlined_call_operand.hbm [shape: f32[4,8], index: 3, kind: output, shape index: {0}]   ;;  %s353_s4 = inlined_call_operand.vmem [shape: f32[1,4,1], index: 4, kind: output, shape index: {1}]   ;;  %s354_s5 = inlined_call_operand.vmem [shape: s32[1,4,1], index: 5, kind: output, shape index: {2}]  }
   0x1   :  { %12 = vsyncpa [#allocation4], 0  ;;  %s259_s18 = smov [#allocation2]   ;;  %s211_s22 = scalar_lea.hbm %s349_s0, 128 }
   0x2   :  { %s24_s19 = sshll.u32 %s259_s18, 4  ;;  %p212_p0 = scmp.ne.s32.totalorder %s349_s0, %s211_s22  ;;  %s25_s19 = int_to_ptr.vmem [resolvable:$true] %s24_s19 }
   0x3   :  { %p215_p1 = scmp.lt.u32.totalorder %s211_s22, %s349_s0 }
   0x5   :  { %p217_p2 = pnand %p215_p1, %p212_p0 }
   0x7   :  { %220 = shalt.err (!%p217_p2)
}
   0x8   :  { %s221_s27 = scalar_lea.vmem %s25_s19, 128  ;;  %p226_p4 = scmp.lt.s32.totalorder %s25_s19, %s25_s19 }
   0x9   :  { %p222_p3 = scmp.ne.s32.totalorder %s25_s19, %s221_s27  ;;  %p227_p5 = scmp.lt.s32.totalorder %s221_s27, %s221_s27 }
   0xb   :  { %p228_p6 = por %p227_p5, %p226_p4 }
   0xd   :  { %p229_p7 = pnand %p228_p6, %p222_p3 }
   0xf   :  { %232 = shalt.err (!%p229_p7)
}
  0x10   :  { %27 = dma.hbm_to_vmem [thread:$0]  %s349_s0, 128, %s25_s19, [#allocation3]  }
  0x11   :  { %255 = dma.done.wait [#allocation3], 128  }
  0x12   :  { %256 = vsyncadd [#allocation3], 4294967168  ;;  %v260_v0 = vmov 0.0   ;;  %vm261_vm0 = vmmov 0   ;;  %vm45_vm1 = vcmask 3072   ;;  %v262_v1 = vmov 0  }
  0x13   :  { %199 = vmatprep.subr.mxu0 %v260_v0  ;;  %201 = vmatprep.mubr.msk.f32.mxu0 %vm261_vm0, %v260_v0  ;;  %v263_v2 = vmov -inf   ;;  %47 = vst.msk [vmem:[%s354_s5] sm:$0xf] %vm45_vm1, %v262_v1  ;;  %vm56_vm2 = vcmask 261120   ;;  %v48_v3 = vld [vmem:[#allocation2] sm:$0xff]  ;;  %vm133_vm3 = vcmask 60416   ;;  %v135_v11 = vlaneseq }
  0x14   :  { %210 = vset.pattern.permute.xlu0 %v262_v1  ;;  %46 = vst.msk [vmem:[%s353_s4] sm:$0xf] %vm45_vm1, %v263_v2  ;;  %v50_v4 = vld [vmem:[%s351_s2] sm:$0xf]  ;;  %200 = vmatpush3.xpose.msk.msra.mxu0 %vm56_vm2, %v48_v3  ;;  %s264_s14 = smov [#allocation5]  }
  0x15   :  { %v49_v5 = vld [vmem:[%s350_s1] sm:$0xf]  ;;  %53 = vperm.xlu0 %210, %v50_v4   ;;  %v136_v12 = vand.u32 127, %v135_v11  ;;  %s176_s15 = sshll.u32 %s264_s14, 4  ;;  %s177_s15 = int_to_ptr.vmem [resolvable:$true] %s176_s15 }
  0x16   :  { %s233_s16 = scalar_lea.vmem %s177_s15, 64  ;;  %p238_p9 = scmp.lt.s32.totalorder %s177_s15, %s177_s15 }
  0x17   :  { %202 = vmatmul.mubr.msk.f32.vlgmr.msra.gmra.mrb[0].mxu0 %vm56_vm2, %v49_v5  ;;  %p234_p8 = scmp.ne.s32.totalorder %s177_s15, %s233_s16  ;;  %p239_p10 = scmp.lt.s32.totalorder %s233_s16, %s233_s16 }
  0x19   :  { %p240_p11 = por %p239_p10, %p238_p9 }
  0x1b   :  { %v159_v13 = vld [vmem:[%s353_s4] sm:$0xf]  ;;  %p241_p12 = pnand %p240_p11, %p234_p8 }
  0x94   :  { %v54_v6 = vpop.permute.xlu0 %53 }
  0xea   :  { %v129_v7 = vpop.f32.mrb[0].mxu0 }
  0xeb   :  { %v130_v8 = vadd.f32 %v129_v7, %v54_v6  ;;  %v203_v9 = vpop.f32.mrb[1].mxu0 }
  0xed   :  { %v139_v10 = vsel %vm133_vm3, %v130_v8, -inf  ;;  %134 = vst.msk [vmem:[#allocation5] sm:$0xf] %vm133_vm3, %v130_v8 }
  0xee   :  { %140 = vmax.xlane.f32.xlu0 %v139_v10 }
 0x17b   :  { %v141_v14 = vpop.xlane.xlu0 %140 }
 0x17c   :  { %vm142_vm4 = vcmp.ge.f32.partialorder %v130_v8, %v141_v14  ;;  %vm160_vm5 = vcmp.gt.f32.partialorder %v141_v14, %v159_v13 }
 0x17d   :  { %v143_v15 = vsel %vm142_vm4, %v136_v12, 2147483647  ;;  %v161_v16 = vsel %vm160_vm5, %v141_v14, %v159_v13 }
 0x17e   :  { %163 = vst.msk [vmem:[%s353_s4] sm:$0xf] %vm45_vm1, %v161_v16  ;;  %v144_v17 = vsel %vm133_vm3, %v143_v15, 2147483647 }
 0x17f   :  { %v146_v18 = vshra.s32 %v144_v17, 16  ;;  %v145_v20 = vand.u32 65535, %v144_v17 }
 0x181   :  { %v148_v19 = vcvt.s32.f32 %v146_v18  ;;  %v147_v22 = vcvt.s32.f32 %v145_v20 }
 0x183   :  { %149 = vmin.xlane.f32.xlu1 %v148_v19 }
 0x210   :  { %v150_v21 = vpop.xlane.xlu1 %149 }
 0x211   :  { %vm151_vm6 = vcmp.eq.f32.partialorder %v148_v19, %v150_v21 }
 0x212   :  { %v152_v23 = vsel %vm151_vm6, %v147_v22, inf }
 0x213   :  { %153 = vmin.xlane.f32.xlu1 %v152_v23 }
 0x214   :  { %244 = shalt.err (!%p241_p12)
}
 0x215   :  { %s245_s18 = scalar_lea.hbm %s352_s3, 64 }
 0x216   :  { %p246_p13 = scmp.ne.s32.totalorder %s352_s3, %s245_s18  ;;  %p249_p0 = scmp.lt.u32.totalorder %s245_s18, %s352_s3 }
 0x218   :  { %p251_p1 = pnand %p249_p0, %p246_p13 }
 0x21a   :  { %254 = shalt.err (!%p251_p1)
}
 0x21b   :  { %179 = dma.vmem_to_hbm [thread:$0]  %s177_s15, 64, %s352_s3, [#allocation4]   ;;  %v156_v24 = vcvt.f32.s32 %v150_v21  ;;  %v164_v28 = vld [vmem:[%s354_s5] sm:$0xf] }
 0x21d   :  { %v157_v26 = vshll.u32 %v156_v24, 16 }
 0x2a0   :  { %v154_v25 = vpop.xlane.xlu1 %153 }
 0x2a1   :  { %v155_v27 = vcvt.f32.s32 %v154_v25 }
 0x2a3   :  { %v158_v29 = vadd.s32 %v157_v26, %v155_v27 }
 0x2a5   :  { %v165_v30 = vsel %vm160_vm5, %v158_v29, %v164_v28 }
 0x2a6   :  { %166 = vst.msk [vmem:[%s354_s5] sm:$0xf] %vm45_vm1, %v165_v30 }
 0x2a7   :  { %257 = dma.done.wait [#allocation4], 64  }
 0x2a8   :  { %258 = vsyncadd [#allocation4], 4294967232 }
 0x2a9   :  { %191 = vsyncpa [#allocation3], 1 }
 0x2aa   :  { %192 = vsyncpa [#allocation4], 1 }

</bundles_post_ra>
